<compile_context>
chip_gen: v5e
topology: v5e:2x2
jax: 0.10.0
libtpu: 0.0.40
codegen_flags: <defaults>
</compile_context>

<pallas_src>
import math
from functools import partial

import jax
import jax.numpy as jnp
from jax.experimental import pallas as pl
from jax.experimental.pallas import tpu as pltpu


# ----------------------------------- GELU variants -----------------------------------

def _gelu_tanh(h):
    # nn.GELU(approximate='tanh'): ~8 VPU ops + 1 EUP tanh.
    c = 0.7978845608028654  # sqrt(2/pi)
    return 0.5 * h * (1.0 + jnp.tanh(c * (h + 0.044715 * (h * h) * h)))


def _gelu_exact(h):
    # PyTorch nn.GELU() default: 0.5*x*(1 + erf(x/sqrt(2))), erf via A&S 7.1.26 (|err| <= 1.5e-7).
    # The divide is replaced by an approximate reciprocal on the EUP slot (review item).
    z = h * 0.7071067811865476
    za = jnp.abs(z)
    sgn = jnp.where(z < 0.0, -1.0, 1.0)
    t = pl.reciprocal(1.0 + 0.3275911 * za, approx=True)
    poly = ((((1.061405429 * t - 1.453152027) * t + 1.421413741) * t
             - 0.284496736) * t + 0.254829592) * t
    erf = sgn * (1.0 - poly * jnp.exp(-(za * za)))
    return 0.5 * h * (1.0 + erf)


def _apply_gelu(h, mode):
    return _gelu_tanh(h) if mode == "tanh" else _gelu_exact(h)


# ------------------------------------- kernels ---------------------------------------

def _mlp_fused_kernel(x_ref, w_ref, b_ref, o_ref, *, compute_dtype, gelu_mode):
    """One (tm, tn) output tile per grid step; K untiled. GELU(x @ W + b)."""
    x = x_ref[...]
    if compute_dtype is not None and x.dtype != compute_dtype:
        x = x.astype(compute_dtype)          # in-kernel activation cast (no extra HBM traffic)
    h = jnp.dot(x, w_ref[...], preferred_element_type=jnp.float32)
    h = h + b_ref[...]
    o_ref[...] = _apply_gelu(h, gelu_mode).astype(o_ref.dtype)
    # TODO(synk): training-mode Dropout (p > 0) not implemented; module default p=0.0 (and eval
    # mode) makes it an identity, matching the reference forward().


def _mlp_ktiled_kernel(x_ref, w_ref, b_ref, o_ref, acc_ref, *, compute_dtype, gelu_mode):
    """K-tiled variant: f32 accumulator in VMEM scratch; bias+GELU epilogue only at k==last."""
    k = pl.program_id(2)

    @pl.when(k == 0)
    def _init():
        acc_ref[...] = jnp.zeros_like(acc_ref)

    x = x_ref[...]
    if compute_dtype is not None and x.dtype != compute_dtype:
        x = x.astype(compute_dtype)
    acc_ref[...] += jnp.dot(x, w_ref[...], preferred_element_type=jnp.float32)

    @pl.when(k == pl.num_programs(2) - 1)
    def _epilogue():
        h = acc_ref[...] + b_ref[...]
        o_ref[...] = _apply_gelu(h, gelu_mode).astype(o_ref.dtype)


# --------------------------------- tile / plan selection ------------------------------

_TM_CANDS = (2048, 1024, 512, 256, 128, 64, 32, 16, 8)
_TN_CANDS = (1024, 512, 256, 128)
_TK_CANDS = (2048, 1024, 512, 256, 128)


def _round_up(v, m):
    return ((v + m - 1) // m) * m


def _fp_fused(tm, k, tn, xi, wi, oi):
    # Double-buffered x / W / bias / out blocks.
    return 2 * (tm * k * xi + k * tn * wi + tn * 4 + tm * tn * oi)


def _fp_ktiled(tm, tk, tn, xi, wi, oi):
    return 2 * (tm * tk * xi + tk * tn * wi + tn * 4 + tm * tn * oi) + tm * tn * 4


def _select_plan(M, K, Nout, xi, wi, oi, budget):
    """Returns (kind, tm, tn, tk); kind in {"resident", "stream", "ktiled"}."""
    # 1) Weight resident, K untiled, 1-D grid over row tiles (W DMA'd exactly once).
    for tm in _TM_CANDS:
        tm_e = min(M, tm)
        if _fp_fused(tm_e, K, Nout, xi, wi, oi) <= budget:
            return ("resident", tm_e, Nout, None)
    # 2) Weight streamed, K untiled: biggest tm first (cuts W re-streaming), then biggest tn.
    for tm in _TM_CANDS:
        tm_e = min(M, tm)
        for tn in _TN_CANDS:
            tn_e = min(Nout, tn)
            if tn_e != Nout and tn_e % 128:
                continue
            if _fp_fused(tm_e, K, tn_e, xi, wi, oi) <= budget:
                return ("stream", tm_e, tn_e, None)
    # 3) K-tiled with f32 accumulator scratch (large C / small VMEM budgets: v7x, v5e).
    for tk in _TK_CANDS:
        tk_e = min(K, tk)
        if tk_e != K and tk_e % 128:
            continue
        for tm in _TM_CANDS:
            tm_e = min(M, tm)
            for tn in _TN_CANDS:
                tn_e = min(Nout, tn)
                if tn_e != Nout and tn_e % 128:
                    continue
                if _fp_ktiled(tm_e, tk_e, tn_e, xi, wi, oi) <= budget:
                    return ("ktiled", tm_e, tn_e, tk_e)
    # Fallback: smallest legal tiles.
    return ("ktiled", min(M, 8), min(Nout, 128), min(K, 128))


# ------------------------------------- wrapper ----------------------------------------

def mlp_forward(x, w1_t, b1, *, matmul_dtype=None, gelu_mode="tanh",
                vmem_budget_bytes=40 * 2**20, plan_override=None):
    """GELU(x @ w1_t + b1) with x: (..., C), w1_t: (C, Nout) (pre-transposed fc1.weight), b1: (Nout,).

    matmul_dtype : optional MXU-input dtype (e.g. jnp.bfloat16); accumulation stays f32.
    gelu_mode    : "tanh" (fast, ~8 VPU ops + EUP tanh) or "exact" (PyTorch nn.GELU() erf form).
    plan_override: optional (kind, tm, tn, tk) to bypass automatic tile selection.
    """
    orig_shape = x.shape
    out_dtype = x.dtype
    C = orig_shape[-1]
    K, Nout = w1_t.shape
    if K != C:
        raise ValueError(f"w1_t shape {w1_t.shape} incompatible with feature dim {C}")

    M = int(math.prod(orig_shape[:-1]))
    x2 = x.reshape(M, C)

    # The weight is the (re-)streamed operand -> its optional bf16 cast happens once here.
    # The activation cast happens inside the kernel (saves an x HBM round-trip).
    w2 = w1_t.astype(matmul_dtype) if matmul_dtype is not None else w1_t
    b2 = b1.reshape(1, Nout).astype(jnp.float32)

    xi = x2.dtype.itemsize
    wi = w2.dtype.itemsize
    oi = jnp.dtype(out_dtype).itemsize

    if plan_override is not None:
        kind, tm, tn, tk = plan_override
        tn = Nout if tn is None else tn
    else:
        kind, tm, tn, tk = _select_plan(M, C, Nout, xi, wi, oi, vmem_budget_bytes)

    # Zero-pad the contraction dim for the K-tiled path so padded K-tiles contribute nothing.
    Kp = C
    if kind == "ktiled" and C % tk:
        Kp = _round_up(C, tk)
        x2 = jnp.pad(x2, ((0, 0), (0, Kp - C)))
        w2 = jnp.pad(w2, ((0, Kp - C), (0, 0)))

    n_i = pl.cdiv(M, tm)
    n_j = pl.cdiv(Nout, tn)

    # Grid ordering / megacore: put the tile axis of the dominant streamed operand outermost
    # (and "parallel") so that operand is fetched once per outer step and split disjointly
    # across v7x's two TensorCores. Row-outer streams x once / W n_i times; col-outer the reverse.
    w_bytes = Kp * Nout * wi
    x_bytes = M * Kp * xi
    row_outer = (x_bytes + n_i * w_bytes) <= (w_bytes + n_j * x_bytes)

    compute_dtype = jnp.dtype(matmul_dtype) if matmul_dtype is not None else None

    if kind == "resident":
        fp = _fp_fused(tm, Kp, Nout, xi, wi, oi)
        grid = (n_i,)
        in_specs = [pl.BlockSpec((tm, Kp), lambda i: (i, 0)),
                    pl.BlockSpec((Kp, Nout), lambda i: (0, 0)),   # constant index -> DMA'd once
                    pl.BlockSpec((1, Nout), lambda i: (0, 0))]
        out_specs = pl.BlockSpec((tm, Nout), lambda i: (i, 0))
        scratch = ()
        dims = ("parallel",)
        kernel = partial(_mlp_fused_kernel, compute_dtype=compute_dtype, gelu_mode=gelu_mode)
    elif kind == "stream":
        fp = _fp_fused(tm, Kp, tn, xi, wi, oi)
        scratch = ()
        dims = ("parallel", "arbitrary")
        kernel = partial(_mlp_fused_kernel, compute_dtype=compute_dtype, gelu_mode=gelu_mode)
        if row_outer:
            grid = (n_i, n_j)
            in_specs = [pl.BlockSpec((tm, Kp), lambda i, j: (i, 0)),
                        pl.BlockSpec((Kp, tn), lambda i, j: (0, j)),
                        pl.BlockSpec((1, tn), lambda i, j: (0, j))]
            out_specs = pl.BlockSpec((tm, tn), lambda i, j: (i, j))
        else:
            grid = (n_j, n_i)
            in_specs = [pl.BlockSpec((tm, Kp), lambda j, i: (i, 0)),
                        pl.BlockSpec((Kp, tn), lambda j, i: (0, j)),
                        pl.BlockSpec((1, tn), lambda j, i: (0, j))]
            out_specs = pl.BlockSpec((tm, tn), lambda j, i: (i, j))
    else:  # "ktiled"
        fp = _fp_ktiled(tm, tk, tn, xi, wi, oi)
        n_k = pl.cdiv(Kp, tk)
        scratch = (pltpu.VMEM((tm, tn), jnp.float32),)
        dims = ("parallel", "arbitrary", "arbitrary")   # k (last) is the reduction axis
        kernel = partial(_mlp_ktiled_kernel, compute_dtype=compute_dtype, gelu_mode=gelu_mode)
        if row_outer:
            grid = (n_i, n_j, n_k)
            in_specs = [pl.BlockSpec((tm, tk), lambda i, j, k: (i, k)),
                        pl.BlockSpec((tk, tn), lambda i, j, k: (k, j)),
                        pl.BlockSpec((1, tn), lambda i, j, k: (0, j))]
            out_specs = pl.BlockSpec((tm, tn), lambda i, j, k: (i, j))
        else:
            grid = (n_j, n_i, n_k)
            in_specs = [pl.BlockSpec((tm, tk), lambda j, i, k: (i, k)),
                        pl.BlockSpec((tk, tn), lambda j, i, k: (k, j)),
                        pl.BlockSpec((1, tn), lambda j, i, k: (0, j))]
            out_specs = pl.BlockSpec((tm, tn), lambda j, i, k: (i, j))

    # Explicit scoped-VMEM limit derived from the actual tile footprint (with headroom);
    # stays within v7x's 64 MiB physical VMEM at the default 40 MiB budget, and lifts the
    # v5e 16 MiB default scoped limit when larger tiles are selected.
    vmem_limit = int(min(128 * 2**20, max(32 * 2**20, fp + fp // 2)))

    cost = pl.CostEstimate(
        flops=2 * M * Nout * C,
        transcendentals=M * Nout,   # one tanh / exp per output element
        bytes_accessed=M * C * xi + C * Nout * wi + Nout * 4 + M * Nout * oi)

    out = pl.pallas_call(
        kernel,
        out_shape=jax.ShapeDtypeStruct((M, Nout), out_dtype),
        grid=grid,
        in_specs=in_specs,
        out_specs=out_specs,
        scratch_shapes=scratch,
        compiler_params=pltpu.CompilerParams(
            dimension_semantics=dims,
            vmem_limit_bytes=vmem_limit),
        cost_estimate=cost,
    )(x2, w2, b2)

    return out.reshape(*orig_shape[:-1], Nout)


# ------------------------------------ reference ---------------------------------------

def mlp_forward_ref(x, w1_t, b1, *, approximate=False):
    """Pure-JAX reference mirroring PyTorch Mlp.forward (GELU, dropout=identity)."""
    h = jnp.dot(x, w1_t, precision=jax.lax.Precision.HIGHEST) + b1
    return jax.nn.gelu(h, approximate=approximate)


# -------------------------------------- demo -------------------------------------------

if __name__ == "__main__":
    key = jax.random.PRNGKey(0)
    k1, k2, k3, k4, k5, k6 = jax.random.split(key, 6)

    # --- Case 1: small shapes implied by the module (batch=2, seq=8, channels=32). -----
    B, N, C = 2, 8, 32
    x = jax.random.normal(k1, (B, N, C), dtype=jnp.float32)
    # PyTorch Linear stores W as (out, in) and computes y = x @ W.T + b; pass the transpose.
    w1 = jax.random.normal(k2, (C, C), dtype=jnp.float32) / jnp.sqrt(C)
    b1 = jax.random.normal(k3, (C,), dtype=jnp.float32) * 0.05
    w1_t = w1.T

    ref_exact = mlp_forward_ref(x, w1_t, b1, approximate=False)
    ref_tanh = mlp_forward_ref(x, w1_t, b1, approximate=True)

    y_tanh = jax.block_until_ready(mlp_forward(x, w1_t, b1))                       # default (fast)
    y_exact = jax.block_until_ready(mlp_forward(x, w1_t, b1, gelu_mode="exact"))   # nn.GELU() semantics
    y_bf16 = jax.block_until_ready(mlp_forward(x, w1_t, b1, matmul_dtype=jnp.bfloat16))

    assert y_tanh.shape == (B, N, C)
    assert jnp.allclose(y_tanh, ref_tanh, rtol=5e-3, atol=5e-3)
    assert jnp.allclose(y_exact, ref_exact, rtol=5e-3, atol=5e-3)
    assert jnp.allclose(y_bf16, ref_tanh, rtol=5e-2, atol=5e-2)

    # --- Case 2: exercise the streamed-weight and K-tiled (accumulator) code paths. ----
    B2, N2, C2 = 2, 8, 256
    x_b = jax.random.normal(k4, (B2, N2, C2), dtype=jnp.float32)
    w_b = jax.random.normal(k5, (C2, C2), dtype=jnp.float32) / jnp.sqrt(C2)
    b_b = jax.random.normal(k6, (C2,), dtype=jnp.float32) * 0.05
    w_b_t = w_b.T

    ref2 = mlp_forward_ref(x_b, w_b_t, b_b, approximate=True)
    y_stream = jax.block_until_ready(
        mlp_forward(x_b, w_b_t, b_b, plan_override=("stream", 8, 128, None)))
    y_ktiled = jax.block_until_ready(
        mlp_forward(x_b, w_b_t, b_b, plan_override=("ktiled", 8, 128, 128)))

    assert y_stream.shape == (B2, N2, C2) and y_ktiled.shape == (B2, N2, C2)
    assert jnp.allclose(y_stream, ref2, rtol=2e-2, atol=2e-2)
    assert jnp.allclose(y_ktiled, ref2, rtol=2e-2, atol=2e-2)
    assert jnp.allclose(y_stream, y_ktiled, rtol=1e-3, atol=1e-3)

    print("KERNEL_OK")
</pallas_src>

<mosaic_0001>
module attributes {stable_mosaic.version = 11 : i64} {
  func.func @_mlp_fused_kernel(%arg0: i32, %arg1: memref<16x32xf32, #tpu.memory_space<vmem>>, %arg2: memref<32x32xf32, #tpu.memory_space<vmem>>, %arg3: memref<1x32xf32, #tpu.memory_space<vmem>>, %arg4: memref<16x32xf32, #tpu.memory_space<vmem>>) attributes {dimension_semantics = [#tpu.dimension_semantics<parallel>], iteration_bounds = array<i64: 1>, scalar_prefetch = 0 : i64, scratch_operands = 0 : i64, tpu.core_type = #tpu.core_type<tc>, window_params = [{transform_indices = @transform_0, window_bounds = array<i64: 16, 32>}, {pipeline_mode = #tpu.pipeline_mode<synchronous>, transform_indices = @transform_1, window_bounds = array<i64: 32, 32>}, {pipeline_mode = #tpu.pipeline_mode<synchronous>, transform_indices = @transform_2, window_bounds = array<i64: 1, 32>}, {transform_indices = @transform_3, window_bounds = array<i64: 16, 32>}]} {
    %c0 = arith.constant 0 : index
    %c0_0 = arith.constant 0 : index
    %0 = vector.load %arg1[%c0, %c0_0] : memref<16x32xf32, #tpu.memory_space<vmem>>, vector<16x32xf32>
    %c0_1 = arith.constant 0 : index
    %c0_2 = arith.constant 0 : index
    %1 = vector.load %arg2[%c0_1, %c0_2] : memref<32x32xf32, #tpu.memory_space<vmem>>, vector<32x32xf32>
    %cst = arith.constant dense<0.000000e+00> : vector<16x32xf32>
    %2 = tpu.matmul %0, %1, %cst {dimension_numbers = #tpu.dot_dimension_numbers<[1], [0], [0], [1], [0, 0, 1, 1], [], []>} : vector<16x32xf32>, vector<32x32xf32>, vector<16x32xf32> -> vector<16x32xf32>
    %c0_3 = arith.constant 0 : index
    %c0_4 = arith.constant 0 : index
    %3 = vector.load %arg3[%c0_3, %c0_4] : memref<1x32xf32, #tpu.memory_space<vmem>>, vector<1x32xf32>
    %4 = vector.broadcast %3 : vector<1x32xf32> to vector<16x32xf32>
    %5 = arith.addf %2, %4 : vector<16x32xf32>
    %cst_5 = arith.constant 5.000000e-01 : f32
    %6 = vector.broadcast %cst_5 : f32 to vector<16x32xf32>
    %7 = arith.mulf %6, %5 : vector<16x32xf32>
    %8 = arith.mulf %5, %5 : vector<16x32xf32>
    %cst_6 = arith.constant 4.471500e-02 : f32
    %9 = vector.broadcast %cst_6 : f32 to vector<16x32xf32>
    %10 = arith.mulf %9, %8 : vector<16x32xf32>
    %11 = arith.mulf %10, %5 : vector<16x32xf32>
    %12 = arith.addf %5, %11 : vector<16x32xf32>
    %cst_7 = arith.constant 0.797884583 : f32
    %13 = vector.broadcast %cst_7 : f32 to vector<16x32xf32>
    %14 = arith.mulf %13, %12 : vector<16x32xf32>
    %15 = math.tanh %14 : vector<16x32xf32>
    %cst_8 = arith.constant 1.000000e+00 : f32
    %16 = vector.broadcast %cst_8 : f32 to vector<16x32xf32>
    %17 = arith.addf %16, %15 : vector<16x32xf32>
    %18 = arith.mulf %7, %17 : vector<16x32xf32>
    %c0_9 = arith.constant 0 : index
    %c0_10 = arith.constant 0 : index
    %19 = vector.load %arg4[%c0_9, %c0_10] : memref<16x32xf32, #tpu.memory_space<vmem>>, vector<16x32xf32>
    tpu.vector_store %arg4[%c0_9, %c0_10], %18 {strides = array<i32>} : memref<16x32xf32, #tpu.memory_space<vmem>>, vector<16x32xf32>,
    return
  }
  func.func @transform_0(%arg0: i32) -> (i32, i32) {
    %c0_i32 = arith.constant 0 : i32
    %c0_i32_0 = arith.constant 0 : i32
    return %arg0, %c0_i32 : i32, i32
  }
  func.func @transform_1(%arg0: i32) -> (i32, i32) {
    %c0_i32 = arith.constant 0 : i32
    %c0_i32_0 = arith.constant 0 : i32
    %c0_i32_1 = arith.constant 0 : i32
    return %c0_i32, %c0_i32_0 : i32, i32
  }
  func.func @transform_2(%arg0: i32) -> (i32, i32) {
    %c0_i32 = arith.constant 0 : i32
    %c0_i32_0 = arith.constant 0 : i32
    %c0_i32_1 = arith.constant 0 : i32
    return %c0_i32, %c0_i32_0 : i32, i32
  }
  func.func @transform_3(%arg0: i32) -> (i32, i32) {
    %c0_i32 = arith.constant 0 : i32
    %c0_i32_0 = arith.constant 0 : i32
    return %arg0, %c0_i32 : i32, i32
  }
}

</mosaic_0001>

<bundles_post_ra>
// kernel: tpu_custom_call.1
= control target key start
LH: loop header
LB: loop body
LE: loop exit
PB: predicated region body
PF: predicated region fallthrough
CT: control target
= control target key end

     0   :  { %8 = vsyncpa [#allocation3], 0  ;;  %s271_s0 = inlined_call_operand.hbm [shape: f32[16,32], index: 0, kind: input, shape index: {}]   ;;  %s272_s1 = inlined_call_operand.hbm [shape: f32[32,32], index: 1, kind: input, shape index: {}]   ;;  %s273_s2 = inlined_call_operand.vmem [shape: f32[1,32], index: 2, kind: input, shape index: {}]   ;;  %s274_s3 = inlined_call_operand.hbm [shape: f32[16,32], index: 3, kind: output, shape index: {}]  }
   0x1   :  { %9 = vsyncpa [#allocation6], 0 }
   0x2   :  { %10 = vsyncpa [#allocation4], 0  ;;  %s15_s14 = sshll.u32 %s271_s0, 4  ;;  %s221_s15 = smov [#allocation2]   ;;  %s16_s14 = int_to_ptr.hbm [resolvable:$true] %s15_s14 }
   0x3   :  { %s17_s16 = sshll.u32 %s221_s15, 4  ;;  %s28_s19 = sshll.u32 %s272_s1, 4  ;;  %s18_s16 = int_to_ptr.vmem [resolvable:$true] %s17_s16  ;;  %s29_s19 = int_to_ptr.hbm [resolvable:$true] %s28_s19 }
   0x4   :  { %s222_s20 = smov 128   ;;  %s223_s21 = smov 8  }
   0x5   :  { %23 = dma.hbm_to_vmem [thread:$0]  %s16_s14, 256, %s18_s16, [#allocation3], %s222_s20, %s222_s20, %s223_s21  }
   0x6   :  { %s224_s22 = smov [#allocation5]  }
   0x7   :  { %s30_s23 = sshll.u32 %s224_s22, 4  ;;  %s31_s23 = int_to_ptr.vmem [resolvable:$true] %s30_s23 }
   0x8   :  { %36 = dma.hbm_to_vmem [thread:$0]  %s29_s19, 512, %s31_s23, [#allocation6], %s222_s20, %s222_s20, %s223_s21  }
   0x9   :  { %215 = dma.done.wait [#allocation3], 256  }
   0xa   :  { %216 = vsyncadd [#allocation3], 4294967040 }
   0xb   :  { %217 = dma.done.wait [#allocation6], 512  }
   0xc   :  { %218 = vsyncadd [#allocation6], 4294966784  ;;  %v52_v0 = vld [vmem:[#allocation5 + $0x18] sm:$0xff]  ;;  %v51_v1 = vld [vmem:[#allocation5 + $0x10] sm:$0xff]  ;;  %vm57_vm0 = vcmask 261120   ;;  %s113_s27 = sshll.u32 %s274_s3, 4  ;;  %s114_s27 = int_to_ptr.hbm [resolvable:$true] %s113_s27 }
   0xd   :  { %76 = vmatpush.msra.mxu0 %v52_v0  ;;  %129 = vmatpush.msra.mxu1 %v52_v0  ;;  %v50_v2 = vld [vmem:[#allocation5 + $0x8] sm:$0xff]  ;;  %v49_v3 = vld [vmem:[#allocation5] sm:$0xff]  ;;  %v47_v4 = vld [vmem:[#allocation2] sm:$0xff] }
   0xe   :  { %v48_v5 = vld [vmem:[#allocation2 + $0x8] sm:$0xff]  ;;  %v138_v6 = vld [vmem:[%s273_s2] ss:$0 sm:$0xff]  ;;  %s225_s2 = smov [#allocation7]  }
   0xf   :  { %77 = vmatpush.msra.mxu0 %v51_v1  ;;  %130 = vmatpush.msra.mxu1 %v51_v1  ;;  %s111_s24 = sshll.u32 %s225_s2, 4  ;;  %s112_s24 = int_to_ptr.vmem [resolvable:$true] %s111_s24 }
  0x11   :  { %78 = vmatpush.msra.mxu0 %v50_v2  ;;  %131 = vmatpush.msra.mxu1 %v50_v2 }
  0x13   :  { %79 = vmatpush.msra.mxu0 %v49_v3  ;;  %132 = vmatpush.msra.mxu1 %v49_v3 }
  0x14   :  { %127 = vmatmul.msk.f32.vlgmr.msra.gmra.mxu0 %vm57_vm0, %v47_v4  ;;  %128 = vmatmul.msk.f32.vlgmr.msra.gmra.mxu1 %vm57_vm0, %v48_v5 }
  0x91   :  { %v81_v7 = vpop.f32.mrf.mxu0  ;;  %v84_v8 = vpop.f32.mrf.mxu1 }
  0x92   :  { %v82_v9 = vadd.f32 %v138_v6, %v81_v7  ;;  %v85_v10 = vadd.f32 %v138_v6, %v84_v8 }
  0x94   :  { %v89_v11 = vmul.f32 %v82_v9, %v82_v9  ;;  %v90_v12 = vmul.f32 %v85_v10, %v85_v10  ;;  %v87_v23 = vmul.f32 0.5, %v82_v9  ;;  %v88_v25 = vmul.f32 0.5, %v85_v10 }
  0x96   :  { %v91_v13 = vmul.f32 0.044715, %v89_v11  ;;  %v92_v14 = vmul.f32 0.044715, %v90_v12 }
  0x98   :  { %v93_v15 = vmul.f32 %v91_v13, %v82_v9  ;;  %v94_v16 = vmul.f32 %v92_v14, %v85_v10 }
  0x9a   :  { %v95_v17 = vadd.f32 %v93_v15, %v82_v9  ;;  %v96_v18 = vadd.f32 %v94_v16, %v85_v10 }
  0x9c   :  { %v97_v19 = vmul.f32 0.7978846, %v95_v17  ;;  %v98_v20 = vmul.f32 0.7978846, %v96_v18 }
  0x9e   :  { %139 = vtanh.f32 %v97_v19 }
  0x9f   :  { %141 = vtanh.f32 %v98_v20 }
  0xa4   :  { %v140_v21 = vpop.eup %139 }
  0xa5   :  { %v142_v22 = vpop.eup %141  ;;  %v101_v24 = vadd.f32 1.0, %v140_v21 }
  0xa6   :  { %v102_v26 = vadd.f32 1.0, %v142_v22 }
  0xa7   :  { %v103_v27 = vmul.f32 %v101_v24, %v87_v23 }
  0xa8   :  { %v104_v28 = vmul.f32 %v102_v26, %v88_v25 }
  0xa9   :  { %105 = vst.msk [vmem:[#allocation7] sm:$0xff] %vm57_vm0, %v103_v27 }
  0xaa   :  { %106 = vst.msk [vmem:[#allocation7 + $0x8] sm:$0xff] %vm57_vm0, %v104_v28 }
  0xab   :  { %119 = dma.vmem_to_hbm [thread:$0]  %s112_s24, 256, %s114_s27, [#allocation4], %s222_s20, %s222_s20, %s223_s21  }
  0xac   :  { %219 = dma.done.wait [#allocation4], 256  }
  0xad   :  { %220 = vsyncadd [#allocation4], 4294967040 }
  0xae   :  { %124 = vsyncpa [#allocation3], 1 }
  0xaf   :  { %125 = vsyncpa [#allocation6], 1 }
  0xb0   :  { %126 = vsyncpa [#allocation4], 1 }

</bundles_post_ra>
